<compile_context>
chip_gen: v7x
topology: tpu7x:2x2x1
jax: 0.10.0
libtpu: 0.0.40
codegen_flags: <defaults>
</compile_context>

<pallas_src>
import math
import numpy as np
import jax
import jax.numpy as jnp
from jax import lax
from jax.experimental import pallas as pl
from jax.experimental.pallas import tpu as pltpu


# ---------------------------------------------------------------------------
# Fused BasicBlock kernel (row-folded layout: activations are (rows, W*C))
# ---------------------------------------------------------------------------
def _make_block_kernel(stride, conv_shortcut, Ho):
    def kernel(*refs):
        if conv_shortcut:
            (x_ref, shift_ref, w2a_ref, b2a_ref, wsc_ref, bsc_ref,
             w2b_ref, b2b_ref, o_ref) = refs
        else:
            (x_ref, shift_ref, w2a_ref, b2a_ref,
             w2b_ref, b2b_ref, o_ref) = refs

        f32 = jnp.float32
        sdn = shift_ref[0]        # (Ho, Ho): (sdn @ d)[i] = d[i-1], row 0 -> 0
        sup = shift_ref[1]        # (Ho, Ho): (sup @ d)[i] = d[i+1], row Ho-1 -> 0

        def conv3(slabs, shifts, w_ref):
            # 3x3 conv as 3 fat row-GEMMs: columns (kw) + horizontal padding
            # are inside the banded weights; the vertical (kh) +-1 row shift
            # and its zero padding are applied exactly by the tiny shift
            # matrices on the MXU.  All loads are full-width & aligned.
            acc = jnp.zeros((Ho, w_ref.shape[-1]), f32)
            for kh in range(3):
                d = jnp.dot(slabs[kh], w_ref[kh], preferred_element_type=f32)
                if shifts[kh] is not None:
                    d = jnp.dot(shifts[kh], d, preferred_element_type=f32)
                acc += d
            return acc

        # -------- branch2a: 3x3 conv (stride 1 or 2) + bias + ReLU --------
        if stride == 2:
            # x_ref: (Ho, 2, W*Cin) -- row parity on axis 1 (free host view).
            # kh=0 reads odd row 2ho-1 (shift down), kh=1 even row 2ho,
            # kh=2 odd row 2ho+1.
            x_e = x_ref[:, 0, :]
            x_o = x_ref[:, 1, :]
            acc = conv3((x_o, x_e, x_o), (sdn, None, None), w2a_ref)
            sc_lhs = x_e
        else:
            # x_ref: (Ho, W*Cin) unpadded; kh=0/2 need a +-1 row shift.
            xr = x_ref[...]
            acc = conv3((xr, xr, xr), (sdn, None, sup), w2a_ref)
            sc_lhs = xr
        y2a = jnp.maximum(acc + b2a_ref[...], 0.0)

        # -------- shortcut branch ------------------------------------------
        if conv_shortcut:
            short = jnp.dot(sc_lhs, wsc_ref[...],
                            preferred_element_type=f32) + bsc_ref[...]
        else:
            # identity shortcut (stride 1, Cin == Cout by module construction)
            short = x_ref[...].astype(f32)

        # -------- branch2b: 3x3 s1 conv + bias + residual + ReLU -----------
        y2a_b = y2a.astype(jnp.bfloat16)          # single cast, stays in vregs
        acc2 = conv3((y2a_b, y2a_b, y2a_b), (sdn, None, sup), w2b_ref)
        out = jnp.maximum(acc2 + b2b_ref[...] + short, 0.0)
        o_ref[...] = out.astype(o_ref.dtype)      # lane-dense bf16 store

    return kernel


# ---------------------------------------------------------------------------
# Host-side helpers (BN folding, banded row-GEMM weights, layout plumbing)
# ---------------------------------------------------------------------------
def _fold_bn(p):
    """Fold the BN scale into the conv weight; return (w_folded, bias)."""
    w = p["w"] * p["scale"].reshape(1, 1, 1, -1)
    return w, p["bias"]


def _band_conv3_weight(w, stride, w_in, w_out):
    """(3,3,Cin,Cout) conv weight -> (3, w_in*Cin, w_out*Cout) bf16 banded
    row-GEMM matrices (one per kh).  kw offsets and the conv's horizontal
    zero padding are encoded in the band structure.  (At Cout >= 128 one
    would use dense per-kh (3*Cin, Cout) weights instead -- see TODO.)"""
    cin, cout = w.shape[2], w.shape[3]
    sel = np.zeros((3, w_in, w_out), np.float32)
    for wo in range(w_out):
        for kw in range(3):
            wi = stride * wo + kw - 1
            if 0 <= wi < w_in:
                sel[kw, wi, wo] = 1.0
    a = jnp.einsum('qio,hqcd->hicod', jnp.asarray(sel), w)
    return a.reshape(3, w_in * cin, w_out * cout).astype(jnp.bfloat16)


def _band_conv1_weight(w, stride, w_in, w_out):
    """(1,1,Cin,Cout) shortcut conv -> (w_in*Cin, w_out*Cout) bf16 row-GEMM
    matrix (stride encoded in the band; 1x1 conv has no padding)."""
    cin, cout = w.shape[2], w.shape[3]
    sel = np.zeros((w_in, w_out), np.float32)
    for wo in range(w_out):
        sel[stride * wo, wo] = 1.0
    s = jnp.einsum('io,cd->icod', jnp.asarray(sel), w[0, 0])
    return s.reshape(w_in * cin, w_out * cout).astype(jnp.bfloat16)


def _tile_bias(b, w_out):
    """(Cout,) bias -> (1, w_out*Cout) f32 row in the folded layout."""
    return jnp.tile(b.reshape(-1), w_out).reshape(1, -1).astype(jnp.float32)


def _shift_mats(Ho):
    """(2, Ho, Ho) f32: [shift-down (zero top row), shift-up (zero bottom)]."""
    sdn = np.eye(Ho, k=-1, dtype=np.float32)
    sup = np.eye(Ho, k=+1, dtype=np.float32)
    return jnp.asarray(np.stack([sdn, sup]))


def basic_block(x_nhwc, bp):
    """One fused BasicBlock.  Accepts NHWC (f32 or bf16), returns bf16 NHWC."""
    N, H, W, Cin = x_nhwc.shape
    stride = bp["stride"]
    conv_shortcut = not bp["shortcut"]

    w2a_f, b2a = _fold_bn(bp["branch2a"])
    w2b_f, b2b = _fold_bn(bp["branch2b"])
    Cout = w2a_f.shape[-1]

    if stride == 2:
        assert H % 2 == 0 and W % 2 == 0
    Ho, Wo = H // stride, W // stride
    KW = W * Cin          # folded input row width
    NL = Wo * Cout        # folded (lane-dense) output row width

    xb = x_nhwc.astype(jnp.bfloat16)
    if stride == 2:
        # free, layout-preserving view: row parity -> axis 2, (W, Cin) folded
        # onto the lane axis.  No jnp.pad copy of the activation.
        x_in = xb.reshape(N, Ho, 2, KW)
        x_spec = pl.BlockSpec((None, Ho, 2, KW), lambda n: (n, 0, 0, 0))
    else:
        x_in = xb.reshape(N, H, KW)
        x_spec = pl.BlockSpec((None, H, KW), lambda n: (n, 0, 0))

    shifts = _shift_mats(Ho)                               # (2, Ho, Ho) f32
    w2a_k = _band_conv3_weight(w2a_f, stride, W, Wo)       # (3, KW, NL)
    w2b_k = _band_conv3_weight(w2b_f, 1, Wo, Wo)           # (3, NL, NL)

    shift_spec = pl.BlockSpec((2, Ho, Ho), lambda n: (0, 0, 0))
    w2a_spec = pl.BlockSpec(w2a_k.shape, lambda n: (0, 0, 0))
    w2b_spec = pl.BlockSpec(w2b_k.shape, lambda n: (0, 0, 0))
    bias_spec = pl.BlockSpec((1, NL), lambda n: (0, 0))

    args = [x_in, shifts, w2a_k, _tile_bias(b2a, Wo)]
    in_specs = [x_spec, shift_spec, w2a_spec, bias_spec]
    if conv_shortcut:
        wsc_f, bsc = _fold_bn(bp["short"])                 # (1,1,Cin,Cout)
        wsc_k = _band_conv1_weight(wsc_f, stride, W, Wo)   # (KW, NL)
        args += [wsc_k, _tile_bias(bsc, Wo)]
        in_specs += [pl.BlockSpec(wsc_k.shape, lambda n: (0, 0)), bias_spec]
    args += [w2b_k, _tile_bias(b2b, Wo)]
    in_specs += [w2b_spec, bias_spec]

    out = pl.pallas_call(
        _make_block_kernel(stride, conv_shortcut, Ho),
        # lane-dense bf16 output rows of width Wo*Cout (= 128 here).
        out_shape=jax.ShapeDtypeStruct((N, Ho, NL), jnp.bfloat16),
        grid_spec=pltpu.PrefetchScalarGridSpec(
            num_scalar_prefetch=0,
            grid=(N,),   # batch-parallel; TODO(synk): add row/Cout tile axes
                         # at production shapes (v7x VMEM, >=4-8 steps/core).
            in_specs=in_specs,
            out_specs=pl.BlockSpec((None, Ho, NL), lambda n: (n, 0, 0)),
        ),
        compiler_params=pltpu.CompilerParams(
            dimension_semantics=("parallel",)),
    )(*args)
    return out.reshape(N, Ho, Wo, Cout)


def blocks_forward(x_nchw, params):
    x = jnp.transpose(x_nchw, (0, 2, 3, 1))       # NCHW -> NHWC
    for bp in params:
        x = basic_block(x, bp)                    # bf16 NHWC between blocks
    # back to NCHW; cast to f32 at the module boundary (fused with transpose)
    return jnp.transpose(x, (0, 3, 1, 2)).astype(jnp.float32)


# ---------------------------------------------------------------------------
# Deterministic parameter construction (synthetic; BN folded, eval semantics)
# ---------------------------------------------------------------------------
def _make_convbn_params(key, k, cin, cout):
    kw_, kg, kb, km, kv = jax.random.split(key, 5)
    w = jax.random.normal(kw_, (k, k, cin, cout), jnp.float32) / math.sqrt(k * k * cin)
    gamma = 1.0 + 0.1 * jax.random.normal(kg, (cout,), jnp.float32)
    beta = 0.1 * jax.random.normal(kb, (cout,), jnp.float32)
    mean = 0.1 * jax.random.normal(km, (cout,), jnp.float32)
    var = 1.0 + 0.1 * jax.random.uniform(kv, (cout,), jnp.float32)
    eps = 1e-5
    scale = gamma / jnp.sqrt(var + eps)
    bias = beta - mean * scale
    return {"w": w, "scale": scale, "bias": bias}


def init_blocks_params(key, ch_in, ch_out, count=2, stage_num=3):
    params = []
    for i in range(count):
        stride = 2 if (i == 0 and stage_num != 2) else 1
        shortcut = False if i == 0 else True
        key, ka, kb2, ks = jax.random.split(key, 4)
        bp = {
            "stride": stride,
            "shortcut": shortcut,
            "branch2a": _make_convbn_params(ka, 3, ch_in, ch_out),
            "branch2b": _make_convbn_params(kb2, 3, ch_out, ch_out),
        }
        if not shortcut:
            # variant='b': 1x1 conv with stride on the shortcut
            bp["short"] = _make_convbn_params(ks, 1, ch_in, ch_out)
        params.append(bp)
        if i == 0:
            ch_in = ch_out  # BasicBlock.expansion == 1
    return params


# ---------------------------------------------------------------------------
# Pure-JAX reference (lax.conv), same bf16-operand / f32-accumulate precision
# ---------------------------------------------------------------------------
def _ref_conv(x, w, stride, pad):
    return lax.conv_general_dilated(
        x, w, (stride, stride), [(pad, pad), (pad, pad)],
        dimension_numbers=("NHWC", "HWIO", "NHWC"),
        preferred_element_type=jnp.float32)


def blocks_forward_ref(x_nchw, params):
    x = jnp.transpose(x_nchw, (0, 2, 3, 1))
    for bp in params:
        stride = bp["stride"]
        xb = x.astype(jnp.bfloat16)
        w2a, b2a = _fold_bn(bp["branch2a"])
        w2b, b2b = _fold_bn(bp["branch2b"])
        y = _ref_conv(xb, w2a.astype(jnp.bfloat16), stride, 1)
        y = jnp.maximum(y + b2a.reshape(1, 1, 1, -1), 0.0)
        z = _ref_conv(y.astype(jnp.bfloat16), w2b.astype(jnp.bfloat16), 1, 1)
        z = z + b2b.reshape(1, 1, 1, -1)
        if not bp["shortcut"]:
            wsc, bsc = _fold_bn(bp["short"])
            s = _ref_conv(xb, wsc.astype(jnp.bfloat16), stride, 0)
            s = s + bsc.reshape(1, 1, 1, -1)
        else:
            s = xb.astype(jnp.float32)
        x = jnp.maximum(z + s, 0.0)
    return jnp.transpose(x, (0, 3, 1, 2))


if __name__ == "__main__":
    N, C_in, H, W = 2, 8, 16, 16
    C_out = 16

    root = jax.random.PRNGKey(0)
    kx, kp = jax.random.split(root)
    x = jax.random.normal(kx, (N, C_in, H, W), jnp.float32)
    params = init_blocks_params(kp, C_in, C_out, count=2, stage_num=3)

    out = blocks_forward(x, params)
    out = jax.block_until_ready(out)

    # stage_num != 2 -> first block has stride 2, so spatial dims halve.
    assert out.shape == (N, C_out, H // 2, W // 2), out.shape

    ref = blocks_forward_ref(x, params)
    np.testing.assert_allclose(np.asarray(out), np.asarray(ref),
                               rtol=2e-2, atol=2e-2)

    print("KERNEL_OK")
</pallas_src>

<mosaic_0001>
module attributes {stable_mosaic.version = 11 : i64} {
  func.func @kernel(%arg0: i32, %arg1: memref<1x8x2x128xbf16, #tpu.memory_space<vmem>>, %arg2: memref<2x8x8xf32, #tpu.memory_space<vmem>>, %arg3: memref<3x128x128xbf16, #tpu.memory_space<vmem>>, %arg4: memref<1x128xf32, #tpu.memory_space<vmem>>, %arg5: memref<128x128xbf16, #tpu.memory_space<vmem>>, %arg6: memref<1x128xf32, #tpu.memory_space<vmem>>, %arg7: memref<3x128x128xbf16, #tpu.memory_space<vmem>>, %arg8: memref<1x128xf32, #tpu.memory_space<vmem>>, %arg9: memref<1x8x128xbf16, #tpu.memory_space<vmem>>) attributes {dimension_semantics = [#tpu.dimension_semantics<parallel>], iteration_bounds = array<i64: 2>, scalar_prefetch = 0 : i64, scratch_operands = 0 : i64, tpu.core_type = #tpu.core_type<tc>, window_params = [{transform_indices = @transform_0, window_bounds = array<i64: 1, 8, 2, 128>}, {pipeline_mode = #tpu.pipeline_mode<synchronous>, transform_indices = @transform_1, window_bounds = array<i64: 2, 8, 8>}, {pipeline_mode = #tpu.pipeline_mode<synchronous>, transform_indices = @transform_2, window_bounds = array<i64: 3, 128, 128>}, {pipeline_mode = #tpu.pipeline_mode<synchronous>, transform_indices = @transform_3, window_bounds = array<i64: 1, 128>}, {pipeline_mode = #tpu.pipeline_mode<synchronous>, transform_indices = @transform_4, window_bounds = array<i64: 128, 128>}, {pipeline_mode = #tpu.pipeline_mode<synchronous>, transform_indices = @transform_5, window_bounds = array<i64: 1, 128>}, {pipeline_mode = #tpu.pipeline_mode<synchronous>, transform_indices = @transform_6, window_bounds = array<i64: 3, 128, 128>}, {pipeline_mode = #tpu.pipeline_mode<synchronous>, transform_indices = @transform_7, window_bounds = array<i64: 1, 128>}, {transform_indices = @transform_8, window_bounds = array<i64: 1, 8, 128>}]} {
    %c0 = arith.constant 0 : index
    %c0_0 = arith.constant 0 : index
    %c0_1 = arith.constant 0 : index
    %0 = vector.load %arg2[%c0, %c0_0, %c0_1] : memref<2x8x8xf32, #tpu.memory_space<vmem>>, vector<1x8x8xf32>
    %1 = vector.shape_cast %0 : vector<1x8x8xf32> to vector<8x8xf32>
    %c1 = arith.constant 1 : index
    %c0_2 = arith.constant 0 : index
    %c0_3 = arith.constant 0 : index
    %2 = vector.load %arg2[%c1, %c0_2, %c0_3] : memref<2x8x8xf32, #tpu.memory_space<vmem>>, vector<1x8x8xf32>
    %3 = vector.shape_cast %2 : vector<1x8x8xf32> to vector<8x8xf32>
    %c0_4 = arith.constant 0 : index
    %c0_5 = arith.constant 0 : index
    %c0_6 = arith.constant 0 : index
    %c0_7 = arith.constant 0 : index
    %4 = vector.load %arg1[%c0_4, %c0_5, %c0_6, %c0_7] : memref<1x8x2x128xbf16, #tpu.memory_space<vmem>>, vector<1x8x1x128xbf16>
    %5 = vector.shape_cast %4 : vector<1x8x1x128xbf16> to vector<8x128xbf16>
    %c0_8 = arith.constant 0 : index
    %c0_9 = arith.constant 0 : index
    %c1_10 = arith.constant 1 : index
    %c0_11 = arith.constant 0 : index
    %6 = vector.load %arg1[%c0_8, %c0_9, %c1_10, %c0_11] : memref<1x8x2x128xbf16, #tpu.memory_space<vmem>>, vector<1x8x1x128xbf16>
    %7 = vector.shape_cast %6 : vector<1x8x1x128xbf16> to vector<8x128xbf16>
    %cst = arith.constant 0.000000e+00 : f32
    %8 = vector.broadcast %cst : f32 to vector<8x128xf32>
    %c0_12 = arith.constant 0 : index
    %c0_13 = arith.constant 0 : index
    %c0_14 = arith.constant 0 : index
    %9 = vector.load %arg3[%c0_12, %c0_13, %c0_14] : memref<3x128x128xbf16, #tpu.memory_space<vmem>>, vector<1x128x128xbf16>
    %10 = vector.shape_cast %9 : vector<1x128x128xbf16> to vector<128x128xbf16>
    %cst_15 = arith.constant dense<0.000000e+00> : vector<8x128xf32>
    %11 = tpu.matmul %7, %10, %cst_15 {dimension_numbers = #tpu.dot_dimension_numbers<[1], [0], [0], [1], [0, 0, 1, 1], [], []>} : vector<8x128xbf16>, vector<128x128xbf16>, vector<8x128xf32> -> vector<8x128xf32>
    %cst_16 = arith.constant dense<0.000000e+00> : vector<8x128xf32>
    %12 = tpu.matmul %1, %11, %cst_16 {dimension_numbers = #tpu.dot_dimension_numbers<[1], [0], [0], [1], [0, 0, 1, 1], [], []>} : vector<8x8xf32>, vector<8x128xf32>, vector<8x128xf32> -> vector<8x128xf32>
    %13 = arith.addf %8, %12 : vector<8x128xf32>
    %c1_17 = arith.constant 1 : index
    %c0_18 = arith.constant 0 : index
    %c0_19 = arith.constant 0 : index
    %14 = vector.load %arg3[%c1_17, %c0_18, %c0_19] : memref<3x128x128xbf16, #tpu.memory_space<vmem>>, vector<1x128x128xbf16>
    %15 = vector.shape_cast %14 : vector<1x128x128xbf16> to vector<128x128xbf16>
    %cst_20 = arith.constant dense<0.000000e+00> : vector<8x128xf32>
    %16 = tpu.matmul %5, %15, %cst_20 {dimension_numbers = #tpu.dot_dimension_numbers<[1], [0], [0], [1], [0, 0, 1, 1], [], []>} : vector<8x128xbf16>, vector<128x128xbf16>, vector<8x128xf32> -> vector<8x128xf32>
    %17 = arith.addf %13, %16 : vector<8x128xf32>
    %c2 = arith.constant 2 : index
    %c0_21 = arith.constant 0 : index
    %c0_22 = arith.constant 0 : index
    %18 = vector.load %arg3[%c2, %c0_21, %c0_22] : memref<3x128x128xbf16, #tpu.memory_space<vmem>>, vector<1x128x128xbf16>
    %19 = vector.shape_cast %18 : vector<1x128x128xbf16> to vector<128x128xbf16>
    %cst_23 = arith.constant dense<0.000000e+00> : vector<8x128xf32>
    %20 = tpu.matmul %7, %19, %cst_23 {dimension_numbers = #tpu.dot_dimension_numbers<[1], [0], [0], [1], [0, 0, 1, 1], [], []>} : vector<8x128xbf16>, vector<128x128xbf16>, vector<8x128xf32> -> vector<8x128xf32>
    %21 = arith.addf %17, %20 : vector<8x128xf32>
    %c0_24 = arith.constant 0 : index
    %c0_25 = arith.constant 0 : index
    %22 = vector.load %arg4[%c0_24, %c0_25] : memref<1x128xf32, #tpu.memory_space<vmem>>, vector<1x128xf32>
    %23 = vector.broadcast %22 : vector<1x128xf32> to vector<8x128xf32>
    %24 = arith.addf %21, %23 : vector<8x128xf32>
    %cst_26 = arith.constant 0.000000e+00 : f32
    %25 = vector.broadcast %cst_26 : f32 to vector<8x128xf32>
    %26 = arith.maximumf %24, %25 : vector<8x128xf32>
    %c0_27 = arith.constant 0 : index
    %c0_28 = arith.constant 0 : index
    %27 = vector.load %arg5[%c0_27, %c0_28] : memref<128x128xbf16, #tpu.memory_space<vmem>>, vector<128x128xbf16>
    %cst_29 = arith.constant dense<0.000000e+00> : vector<8x128xf32>
    %28 = tpu.matmul %5, %27, %cst_29 {dimension_numbers = #tpu.dot_dimension_numbers<[1], [0], [0], [1], [0, 0, 1, 1], [], []>} : vector<8x128xbf16>, vector<128x128xbf16>, vector<8x128xf32> -> vector<8x128xf32>
    %c0_30 = arith.constant 0 : index
    %c0_31 = arith.constant 0 : index
    %29 = vector.load %arg6[%c0_30, %c0_31] : memref<1x128xf32, #tpu.memory_space<vmem>>, vector<1x128xf32>
    %30 = vector.broadcast %29 : vector<1x128xf32> to vector<8x128xf32>
    %31 = arith.addf %28, %30 : vector<8x128xf32>
    %32 = arith.truncf %26 : vector<8x128xf32> to vector<8x128xbf16>
    %cst_32 = arith.constant 0.000000e+00 : f32
    %33 = vector.broadcast %cst_32 : f32 to vector<8x128xf32>
    %c0_33 = arith.constant 0 : index
    %c0_34 = arith.constant 0 : index
    %c0_35 = arith.constant 0 : index
    %34 = vector.load %arg7[%c0_33, %c0_34, %c0_35] : memref<3x128x128xbf16, #tpu.memory_space<vmem>>, vector<1x128x128xbf16>
    %35 = vector.shape_cast %34 : vector<1x128x128xbf16> to vector<128x128xbf16>
    %cst_36 = arith.constant dense<0.000000e+00> : vector<8x128xf32>
    %36 = tpu.matmul %32, %35, %cst_36 {dimension_numbers = #tpu.dot_dimension_numbers<[1], [0], [0], [1], [0, 0, 1, 1], [], []>} : vector<8x128xbf16>, vector<128x128xbf16>, vector<8x128xf32> -> vector<8x128xf32>
    %cst_37 = arith.constant dense<0.000000e+00> : vector<8x128xf32>
    %37 = tpu.matmul %1, %36, %cst_37 {dimension_numbers = #tpu.dot_dimension_numbers<[1], [0], [0], [1], [0, 0, 1, 1], [], []>} : vector<8x8xf32>, vector<8x128xf32>, vector<8x128xf32> -> vector<8x128xf32>
    %38 = arith.addf %33, %37 : vector<8x128xf32>
    %c1_38 = arith.constant 1 : index
    %c0_39 = arith.constant 0 : index
    %c0_40 = arith.constant 0 : index
    %39 = vector.load %arg7[%c1_38, %c0_39, %c0_40] : memref<3x128x128xbf16, #tpu.memory_space<vmem>>, vector<1x128x128xbf16>
    %40 = vector.shape_cast %39 : vector<1x128x128xbf16> to vector<128x128xbf16>
    %cst_41 = arith.constant dense<0.000000e+00> : vector<8x128xf32>
    %41 = tpu.matmul %32, %40, %cst_41 {dimension_numbers = #tpu.dot_dimension_numbers<[1], [0], [0], [1], [0, 0, 1, 1], [], []>} : vector<8x128xbf16>, vector<128x128xbf16>, vector<8x128xf32> -> vector<8x128xf32>
    %42 = arith.addf %38, %41 : vector<8x128xf32>
    %c2_42 = arith.constant 2 : index
    %c0_43 = arith.constant 0 : index
    %c0_44 = arith.constant 0 : index
    %43 = vector.load %arg7[%c2_42, %c0_43, %c0_44] : memref<3x128x128xbf16, #tpu.memory_space<vmem>>, vector<1x128x128xbf16>
    %44 = vector.shape_cast %43 : vector<1x128x128xbf16> to vector<128x128xbf16>
    %cst_45 = arith.constant dense<0.000000e+00> : vector<8x128xf32>
    %45 = tpu.matmul %32, %44, %cst_45 {dimension_numbers = #tpu.dot_dimension_numbers<[1], [0], [0], [1], [0, 0, 1, 1], [], []>} : vector<8x128xbf16>, vector<128x128xbf16>, vector<8x128xf32> -> vector<8x128xf32>
    %cst_46 = arith.constant dense<0.000000e+00> : vector<8x128xf32>
    %46 = tpu.matmul %3, %45, %cst_46 {dimension_numbers = #tpu.dot_dimension_numbers<[1], [0], [0], [1], [0, 0, 1, 1], [], []>} : vector<8x8xf32>, vector<8x128xf32>, vector<8x128xf32> -> vector<8x128xf32>
    %47 = arith.addf %42, %46 : vector<8x128xf32>
    %c0_47 = arith.constant 0 : index
    %c0_48 = arith.constant 0 : index
    %48 = vector.load %arg8[%c0_47, %c0_48] : memref<1x128xf32, #tpu.memory_space<vmem>>, vector<1x128xf32>
    %49 = vector.broadcast %48 : vector<1x128xf32> to vector<8x128xf32>
    %50 = arith.addf %47, %49 : vector<8x128xf32>
    %51 = arith.addf %50, %31 : vector<8x128xf32>
    %cst_49 = arith.constant 0.000000e+00 : f32
    %52 = vector.broadcast %cst_49 : f32 to vector<8x128xf32>
    %53 = arith.maximumf %51, %52 : vector<8x128xf32>
    %54 = arith.truncf %53 : vector<8x128xf32> to vector<8x128xbf16>
    %c0_50 = arith.constant 0 : index
    %c0_51 = arith.constant 0 : index
    %c0_52 = arith.constant 0 : index
    %55 = vector.load %arg9[%c0_50, %c0_51, %c0_52] : memref<1x8x128xbf16, #tpu.memory_space<vmem>>, vector<1x8x128xbf16>
    %56 = vector.shape_cast %55 : vector<1x8x128xbf16> to vector<8x128xbf16>
    %57 = vector.shape_cast %54 : vector<8x128xbf16> to vector<1x8x128xbf16>
    tpu.vector_store %arg9[%c0_50, %c0_51, %c0_52], %57 {strides = array<i32>} : memref<1x8x128xbf16, #tpu.memory_space<vmem>>, vector<1x8x128xbf16>,
    return
  }
  func.func @transform_0(%arg0: i32) -> (i32, i32, i32, i32) {
    %c0_i32 = arith.constant 0 : i32
    %c0_i32_0 = arith.constant 0 : i32
    %c0_i32_1 = arith.constant 0 : i32
    %c0_i32_2 = arith.constant 0 : i32
    return %arg0, %c0_i32, %c0_i32_0, %c0_i32_1 : i32, i32, i32, i32
  }
  func.func @transform_1(%arg0: i32) -> (i32, i32, i32) {
    %c0_i32 = arith.constant 0 : i32
    %c0_i32_0 = arith.constant 0 : i32
    %c0_i32_1 = arith.constant 0 : i32
    %c0_i32_2 = arith.constant 0 : i32
    return %c0_i32, %c0_i32_0, %c0_i32_1 : i32, i32, i32
  }
  func.func @transform_2(%arg0: i32) -> (i32, i32, i32) {
    %c0_i32 = arith.constant 0 : i32
    %c0_i32_0 = arith.constant 0 : i32
    %c0_i32_1 = arith.constant 0 : i32
    %c0_i32_2 = arith.constant 0 : i32
    return %c0_i32, %c0_i32_0, %c0_i32_1 : i32, i32, i32
  }
  func.func @transform_3(%arg0: i32) -> (i32, i32) {
    %c0_i32 = arith.constant 0 : i32
    %c0_i32_0 = arith.constant 0 : i32
    %c0_i32_1 = arith.constant 0 : i32
    return %c0_i32, %c0_i32_0 : i32, i32
  }
  func.func @transform_4(%arg0: i32) -> (i32, i32) {
    %c0_i32 = arith.constant 0 : i32
    %c0_i32_0 = arith.constant 0 : i32
    %c0_i32_1 = arith.constant 0 : i32
    return %c0_i32, %c0_i32_0 : i32, i32
  }
  func.func @transform_5(%arg0: i32) -> (i32, i32) {
    %c0_i32 = arith.constant 0 : i32
    %c0_i32_0 = arith.constant 0 : i32
    %c0_i32_1 = arith.constant 0 : i32
    return %c0_i32, %c0_i32_0 : i32, i32
  }
  func.func @transform_6(%arg0: i32) -> (i32, i32, i32) {
    %c0_i32 = arith.constant 0 : i32
    %c0_i32_0 = arith.constant 0 : i32
    %c0_i32_1 = arith.constant 0 : i32
    %c0_i32_2 = arith.constant 0 : i32
    return %c0_i32, %c0_i32_0, %c0_i32_1 : i32, i32, i32
  }
  func.func @transform_7(%arg0: i32) -> (i32, i32) {
    %c0_i32 = arith.constant 0 : i32
    %c0_i32_0 = arith.constant 0 : i32
    %c0_i32_1 = arith.constant 0 : i32
    return %c0_i32, %c0_i32_0 : i32, i32
  }
  func.func @transform_8(%arg0: i32) -> (i32, i32, i32) {
    %c0_i32 = arith.constant 0 : i32
    %c0_i32_0 = arith.constant 0 : i32
    %c0_i32_1 = arith.constant 0 : i32
    return %arg0, %c0_i32, %c0_i32_0 : i32, i32, i32
  }
}

</mosaic_0001>

<bundles_post_ra>
// kernel: tpu_custom_call.1
= control target key start
LH: loop header
LB: loop body
LE: loop exit
PB: predicated region body
PF: predicated region fallthrough
CT: control target
= control target key end

     0   :  { %s2807_s0 = inlined_call_operand.hbm [shape: bf16[2,8,2,128], index: 0, kind: input, shape index: {}]   ;;  %s2808_s1 = inlined_call_operand.hbm [shape: f32[2,8,8], index: 1, kind: input, shape index: {}]   ;;  %s2809_s2 = inlined_call_operand.hbm [shape: bf16[3,128,128], index: 2, kind: input, shape index: {}]   ;;  %s2810_s3 = inlined_call_operand.vmem [shape: f32[1,128], index: 3, kind: input, shape index: {}]   ;;  %s2811_s4 = inlined_call_operand.hbm [shape: bf16[128,128], index: 4, kind: input, shape index: {}]   ;;  %s2812_s5 = inlined_call_operand.vmem [shape: f32[1,128], index: 5, kind: input, shape index: {}]   ;;  %s2813_s6 = inlined_call_operand.hbm [shape: bf16[3,128,128], index: 6, kind: input, shape index: {}]   ;;  %s2814_s7 = inlined_call_operand.vmem [shape: f32[1,128], index: 7, kind: input, shape index: {}]   ;;  %s2815_s8 = inlined_call_operand.hbm [shape: bf16[2,8,128], index: 8, kind: output, shape index: {}]  }
   0x1   :  { %2822 = sst [smem:[#allocation18_spill]] %s2815_s8 }
   0x2   :  { %13 = vsyncpa [#allocation3], 0 }
   0x3   :  { %15 = vsyncpa [#allocation3 + $0x1], 0 }
   0x4   :  { %16 = vsyncpa [#allocation6], 0 }
   0x5   :  { %17 = vsyncpa [#allocation9], 0 }
   0x6   :  { %18 = vsyncpa [#allocation4], 0 }
   0x7   :  { %20 = vsyncpa [#allocation4 + $0x1], 0  ;;  %s2409_s27 = smov 0   ;;  %s2411_s28 = smov 0  }
   0x8   :  { %s2413_s29 = smov 0   ;;  %s2415_s30 = smov 0  }
   0x9 LB: > { %2823 = sst [smem:[#allocation16_spill]] %s2335_s27  ;;  %s2430_s9 = sadd.s32 4294967295, %s2347_s30   ;;  %s2347_s30 = sphi %s2415_s30, %s2847_s30   ;;  %s2343_s29 = sphi %s2413_s29, %s2846_s29   ;;  %s2339_s28 = sphi %s2411_s28, %s2845_s28   ;;  %s2335_s27 = sphi %s2409_s27, %s2844_s27  }
   0xa   : > { %s1663_s10 = sadd.s32 4294967294, %s2347_s30   ;;  %p46_p0 = scmp.ne.s32.totalorder %s2339_s28, %s2335_s27 }
   0xb   : > { %p2816_p1 = scmp.eq.s32.totalorder %s2430_s9, 0  ;;  %p223_p3 = scmp.eq.s32.totalorder %s1663_s10, 1 }
   0xc   : > { %p1664_p5 = scmp.ge.s32.totalorder %s2347_s30, 1  ;;  %p230_p7 = scmp.lt.s32.totalorder %s2347_s30, 3 }
   0xd   : > { %p2439_p4 = por %p2816_p1, %p46_p0  ;;  %p2444_p6 = por %p223_p3, %p46_p0 }
   0xe   : > { %p2449_p8 = pnand %p1664_p5, %p230_p7  ;;  %s2349_s14 = smov [#allocation5]  }
   0xf   : > { %s2824_s11 = scalar_select %p2439_p4, 1, 0 }
  0x10   : > { %s2825_s12 = scalar_select %p2444_p6, 1, 0 }
  0x11   : > { %s2827_s13 = scalar_select %p2449_p8, 1, 0 }
  0x12   : > { %2826 = sst [smem:[#allocation17_spill]] %s2825_s12  ;;  %s242_s15 = sshll.u32 %s2349_s14, 4  ;;  %s243_s15 = int_to_ptr.vmem [resolvable:$true] %s242_s15 }
  0x13   : > { %p1999_p9 = pneg %p2449_p8  ;;  %s2350_s17 = smov [#allocation8]  }
  0x14   : > { %s271_s18 = sshll.u32 %s2350_s17, 4  ;;  %s2131_s21 = scalar_lea.hbm %s2808_s1, 256  ;;  %s272_s18 = int_to_ptr.vmem [resolvable:$true] %s271_s18 }
  0x15   : > { %p2458_p11 = pnand %p1999_p9, %p2816_p1  ;;  %p2132_p12 = scmp.ne.s32.totalorder %s2808_s1, %s2131_s21 }
  0x16   : > { %p2138_p5 = scmp.lt.u32.totalorder %s2131_s21, %s2808_s1 }
  0x17   : > { %p2470_p13 = pneg %p2458_p11 }
  0x19   : > { %p2134_p0 = pnand %p2470_p13, %p2132_p12 }
  0x1b   : > { %p2135_p3 = pneg %p2134_p0 }
  0x1d   : > { %p2140_p7 = pnand %p2138_p5, %p2135_p3 }
  0x1f   : > { %2143 = shalt.err (!%p2140_p7)
}
  0x20   : > { %s2144_s10 = scalar_lea.vmem %s243_s15, 256  ;;  %p2152_p2 = scmp.lt.s32.totalorder %s243_s15, %s243_s15 }
  0x21   : > { %p2145_p9 = scmp.ne.s32.totalorder %s243_s15, %s2144_s10  ;;  %p2153_p6 = scmp.lt.s32.totalorder %s2144_s10, %s2144_s10 }
  0x23   : > { %p2147_p10 = pnand %p2145_p9, %p2470_p13  ;;  %p2154_p4 = por %p2153_p6, %p2152_p2 }
  0x25   : > { %p2148_p1 = pneg %p2147_p10 }
  0x27   : > { %p2155_p8 = pnand %p2154_p4, %p2148_p1 }
  0x29   : > { %2158 = shalt.err (!%p2155_p8)
}
  0x2a   : > { %s2351_s14 = smov 128   ;;  %s2352_s17 = smov 8  }
  0x2b   : > { %2002 = dma.hbm_to_vmem [thread:$0]  (!%p2458_p11), %s2808_s1, 256, %s243_s15, [#allocation6], %s2351_s14, %s2351_s14, %s2352_s17  }
  0x2c   : > { %s2353_s21 = smov [#allocation7]   ;;  %s2159_s26 = scalar_lea.hbm %s2811_s4, 1024 }
  0x2d   : > { %s255_s22 = sshll.u32 %s2353_s21, 4  ;;  %p2160_p1 = scmp.ne.s32.totalorder %s2811_s4, %s2159_s26  ;;  %s256_s22 = int_to_ptr.vmem [resolvable:$true] %s255_s22 }
  0x2e   : > { %p2166_p6 = scmp.lt.u32.totalorder %s2159_s26, %s2811_s4 }
  0x2f   : > { %p2162_p2 = pnand %p2160_p1, %p2470_p13 }
  0x31   : > { %p2163_p4 = pneg %p2162_p2 }
  0x33   : > { %p2168_p8 = pnand %p2166_p6, %p2163_p4 }
  0x35   : > { %2171 = shalt.err (!%p2168_p8)
}
  0x36   : > { %s2172_s15 = scalar_lea.vmem %s272_s18, 1024  ;;  %p2180_p3 = scmp.lt.s32.totalorder %s272_s18, %s272_s18 }
  0x37   : > { %p2173_p10 = scmp.ne.s32.totalorder %s272_s18, %s2172_s15  ;;  %p2181_p5 = scmp.lt.s32.totalorder %s2172_s15, %s2172_s15 }
  0x39   : > { %p2175_p12 = pnand %p2173_p10, %p2470_p13  ;;  %p2182_p7 = por %p2181_p5, %p2180_p3 }
  0x3b   : > { %p2176_p0 = pneg %p2175_p12 }
  0x3d   : > { %p2183_p9 = pnand %p2182_p7, %p2176_p0 }
  0x3f   : > { %2186 = shalt.err (!%p2183_p9)
}
  0x40   : > { %s2354_s12 = smov 64   ;;  %s2355_s14 = smov 4  }
  0x41   : > { %2008 = dma.hbm_to_vmem [thread:$0]  (!%p2458_p11), %s2811_s4, 1024, %s272_s18, [#allocation9], %s2354_s12, %s2354_s12, %s2355_s14  }
  0x42   : > { %s2187_s20 = scalar_lea.hbm %s2809_s2, 3072 }
  0x43   : > { %p2188_p1 = scmp.ne.s32.totalorder %s2809_s2, %s2187_s20  ;;  %p2194_p6 = scmp.lt.u32.totalorder %s2187_s20, %s2809_s2 }
  0x45   : > { %p2190_p2 = pnand %p2188_p1, %p2470_p13 }
  0x47   : > { %p2191_p4 = pneg %p2190_p2 }
  0x49   : > { %p2196_p8 = pnand %p2194_p6, %p2191_p4 }
  0x4b   : > { %2199 = shalt.err (!%p2196_p8)
}
  0x4c   : > { %s2200_s10 = scalar_lea.vmem %s256_s22, 3072  ;;  %p2208_p3 = scmp.lt.s32.totalorder %s256_s22, %s256_s22 }
  0x4d   : > { %p2201_p10 = scmp.ne.s32.totalorder %s256_s22, %s2200_s10  ;;  %p2209_p5 = scmp.lt.s32.totalorder %s2200_s10, %s2200_s10 }
  0x4f   : > { %p2203_p12 = pnand %p2201_p10, %p2470_p13  ;;  %p2210_p7 = por %p2209_p5, %p2208_p3 }
  0x51   : > { %p2204_p0 = pneg %p2203_p12 }
  0x53   : > { %p2211_p9 = pnand %p2210_p7, %p2204_p0 }
  0x55   : > { %2214 = shalt.err (!%p2211_p9)
}
  0x56   : > { %2005 = dma.hbm_to_vmem [thread:$0]  (!%p2458_p11), %s2809_s2, 3072, %s256_s22, [#allocation6], %s2354_s12, %s2354_s12, %s2355_s14  }
  0x57   : > { %s2356_s8 = smov [#allocation10]   ;;  %s2215_s20 = scalar_lea.hbm %s2813_s6, 3072 }
  0x58   : > { %s287_s27 = sshll.u32 %s2356_s8, 4  ;;  %p2216_p1 = scmp.ne.s32.totalorder %s2813_s6, %s2215_s20  ;;  %s288_s27 = int_to_ptr.vmem [resolvable:$true] %s287_s27 }
  0x59   : > { %p2222_p6 = scmp.lt.u32.totalorder %s2215_s20, %s2813_s6 }
  0x5a   : > { %p2218_p2 = pnand %p2216_p1, %p2470_p13 }
  0x5c   : > { %p2219_p4 = pneg %p2218_p2 }
  0x5e   : > { %p2224_p8 = pnand %p2222_p6, %p2219_p4 }
  0x60   : > { %2227 = shalt.err (!%p2224_p8)
}
  0x61   : > { %s2228_s22 = scalar_lea.vmem %s288_s27, 3072  ;;  %p2236_p3 = scmp.lt.s32.totalorder %s288_s27, %s288_s27 }
  0x62   : > { %p2229_p10 = scmp.ne.s32.totalorder %s288_s27, %s2228_s22  ;;  %p2237_p5 = scmp.lt.s32.totalorder %s2228_s22, %s2228_s22 }
  0x64   : > { %p2231_p12 = pnand %p2229_p10, %p2470_p13  ;;  %p2238_p7 = por %p2237_p5, %p2236_p3 }
  0x66   : > { %p2232_p0 = pneg %p2231_p12 }
  0x68   : > { %p2239_p9 = pnand %p2238_p7, %p2232_p0 }
  0x6a   : > { %2242 = shalt.err (!%p2239_p9)
}
  0x6b   : > { %2011 = dma.hbm_to_vmem [thread:$0]  (!%p2458_p11), %s2813_s6, 3072, %s288_s27, [#allocation9], %s2354_s12, %s2354_s12, %s2355_s14  }
  0x6c   : > { %s2550_s24 = sadd.s32 1, %s2347_s30   ;;  %s33_s16 = sadd.s32 1, %s2343_s29 }
  0x6d   : > { %s30_s15 = ssub.s32 %s2347_s30, %s2550_s24  ;;  %p40_p13 = scmp.ne.s32.totalorder %s2343_s29, %s2339_s28 }
  0x6e   : > { %p31_p1 = scmp.eq.s32.totalorder %s30_s15, 0  ;;  %p41_p2 = scmp.eq.s32.totalorder %s2347_s30, 0 }
  0x6f   : > { %p2830_p4 = scmp.eq.s32.totalorder %s2430_s9, 1  ;;  %p2024_p8 = scmp.lt.s32.totalorder %s2347_s30, 2 }
  0x70   : > { %s2566_s17 = scalar_select %p31_p1, %s2343_s29, %s33_s16  }
  0x71   : > { %p2560_p6 = por %p2830_p4, %p40_p13  ;;  %p42_p10 = por %p41_p2, %p40_p13 }
  0x72   : > { %s304_s19 = sand.u32 1, %s2343_s29   ;;  %s1754_s12 = sshll.u32 %s2347_s30, 7 }
  0x73   : > { %s1670_s20 = sshll.u32 %s304_s19, 3  ;;  %s2573_s21 = scalar_lea.hbm %s2807_s0, %s1754_s12 }
  0x74   : > { %s308_s23 = scalar_lea.vmem [#allocation2], %s1670_s20  ;;  %p2577_p11 = pnand %p2024_p8, %p42_p10 }
  0x75   : > { %s315_s25 = sshll.u32 %s308_s23, 4  ;;  %s2581_s22 = scalar_lea.sflag [#allocation3], %s304_s19  ;;  %s2575_s25 = int_to_ptr.vmem [resolvable:$true] %s315_s25 }
  0x76   : > { %s2243_s10 = scalar_lea.hbm %s2573_s21, 128  ;;  %p2245_p0 = pneg %p2577_p11 }
  0x77   : > { %p2244_p12 = scmp.ne.s32.totalorder %s2573_s21, %s2243_s10  ;;  %s2248_s15 = scalar_lea.hbm %s2807_s0, 256 }
  0x78   : > { %p2249_p7 = scmp.lt.u32.totalorder %s2573_s21, %s2807_s0  ;;  %p2250_p9 = scmp.lt.u32.totalorder %s2248_s15, %s2243_s10 }
  0x79   : > { %p2246_p3 = pnand %p2245_p0, %p2244_p12  ;;  %p2252_p1 = scmp.lt.u32.totalorder %s2243_s10, %s2573_s21 }
  0x7a   : > { %p2251_p13 = por %p2250_p9, %p2249_p7 }
  0x7b   : > { %p2247_p5 = pneg %p2246_p3 }
  0x7c   : > { %p2253_p2 = por %p2252_p1, %p2251_p13 }
  0x7e   : > { %p2254_p4 = pnand %p2253_p2, %p2247_p5 }
  0x80   : > { %2257 = shalt.err (!%p2254_p4)
}
  0x81   : > { %s2258_s19 = scalar_lea.vmem %s2575_s25, 128  ;;  %s2357_s14 = smov [#allocation2]  }
  0x82   : > { %p2259_p8 = scmp.ne.s32.totalorder %s2575_s25, %s2258_s19  ;;  %s2263_s27 = sshll.u32 %s2357_s14, 4  ;;  %s2264_s27 = int_to_ptr.vmem [resolvable:$false] %s2263_s27 }
  0x83   : > { %s2265_s23 = scalar_lea.vmem %s2264_s27, 256  ;;  %p2266_p3 = scmp.lt.s32.totalorder %s2575_s25, %s2264_s27 }
  0x84   : > { %p2261_p10 = pnand %p2259_p8, %p2245_p0  ;;  %p2267_p7 = scmp.lt.s32.totalorder %s2265_s23, %s2258_s19 }
  0x86   : > { %p2262_p12 = pneg %p2261_p10  ;;  %p2268_p9 = por %p2267_p7, %p2266_p3 }
  0x88   : > { %p2269_p13 = pnand %p2268_p9, %p2262_p12 }
  0x8a   : > { %2272 = shalt.err (!%p2269_p13)
}
  0x8b   : > { %s2358_s10 = smov 16   ;;  %s2359_s18 = smov 1  }
  0x8c   : > { %2015 = dma.hbm_to_vmem [thread:$0]  (!%p2577_p11), %s2573_s21, 128, %s2575_s25, %s2581_s22, %s2358_s10, %s2358_s10, %s2359_s18  }
  0x8d   : > { %p2833_p0 = scmp.ne.s32.totalorder %s2827_s13, 0 }
  0x8e   : > { %s2612_s16 = sand.u32 (!%p2833_p0), 1, %s2339_s28   ;;  %p2834_p5 = scmp.ne.s32.totalorder (!%p2833_p0), %s2824_s11, 0 }
  0x8f   : > { %327 = sbr.rel (%p2833_p0) target bundleno = 1138 (0x472), region = 52  ;;  %s1674_s15 = sshll.u32 (!%p2833_p0), %s2612_s16, 3 }
  0x90   : > { %s330_s20 = scalar_lea.sflag (!%p2833_p0), [#allocation3], %s2612_s16  ;;  %s2616_s12 = scalar_lea.vmem (!%p2833_p0), [#allocation2], %s1674_s15 }
  0x96   : > { %2318 = dma.done.wait (%p2834_p5), %s330_s20, 128  }
  0x97   : > { %2320 = vsyncadd (%p2834_p5), %s330_s20, 4294967168  ;;  %p2835_p11 = scmp.eq.s32.totalorder %s2430_s9, 0 }
  0x99   : > { %2322 = dma.done.wait (%p2835_p11), [#allocation6], 3328   ;;  %p2836_p1 = pmov %p2835_p11 }
  0x9b   : > { %2324 = vsyncadd (%p2836_p1), [#allocation6], 4294963968  ;;  %p2837_p2 = pmov %p2836_p1 }
  0x9c   : > { %p2838_p4 = pmov %p2836_p1 }
  0x9d   : > { %2326 = dma.done.wait (%p2837_p2), [#allocation9], 4096  }
  0x9e   : > { %2328 = vsyncadd (%p2838_p4), [#allocation9], 4294963200  ;;  %v2360_v0 = vmov 0.0   ;;  %vm2361_vm0 = vmmov 0   ;;  %v2362_v1 = vmov 1966171168   ;;  %v428_v3 = vlaneseq }
  0x9f   : > { %1824 = vmatprep.subr.bf16.mxu0 %v2360_v0  ;;  %1840 = vmatprep.mubr.msk.bf16.mxu0 %vm2361_vm0, %v2360_v0  ;;  %v426_v2 = vunpack.c.l.s4 %v2362_v1  ;;  %v2075_v4 = vld [vmem:[#allocation7] sm:$0xff]   ;;  %v2076_v7 = vld [vmem:[#allocation7 + $0x8] sm:$0xff]   ;;  %v2077_v9 = vld [vmem:[#allocation7 + $0x10] sm:$0xff]   ;;  %vm539_vm1 = vcmask 1041409   ;;  %vm542_vm2 = vcmask 1042434   ;;  %vm545_vm3 = vcmask 1043459  }
  0xa0   : > { %1844 = vmatprep.subr.bf16.mxu1 %v2360_v0  ;;  %1860 = vmatprep.mubr.msk.bf16.mxu1 %vm2361_vm0, %v2360_v0  ;;  %v429_v6 = vshrl.u32 %v428_v3, 7  ;;  %v2078_v10 = vld [vmem:[#allocation7 + $0x18] sm:$0xff]   ;;  %v1680_v11 = vld.sshfl [vmem:[%s2616_s12] sm:$0x1 pattern:$0x75316420] }
  0xa1   : > { %v427_v5 = vunpack.c.0.s8 %v426_v2  ;;  %1825 = vmatpush3.bf16.msra.mxu0 %v2075_v4  ;;  %vm548_vm4 = vcmask 1044484   ;;  %v1681_v12 = vld.sshfl [vmem:[%s2616_s12 + $0x1] sm:$0x1 pattern:$0x75316420]  ;;  %vm551_vm5 = vcmask 1045509  }
  0xa2   : > { %1826 = vmatprep.subr.bf16.mxu0 %v2360_v0  ;;  %v1682_v14 = vld.sshfl [vmem:[%s2616_s12 + $0x2] sm:$0x1 pattern:$0x75316420]  ;;  %v2085_v40 = vld [vmem:[#allocation7 + $0x50] sm:$0xff]   ;;  %vm554_vm6 = vcmask 1046534  }
  0xa3   : > { %v430_v8 = vsub.s32 %v427_v5, %v429_v6  ;;  %v2083_v16 = vld [vmem:[#allocation7 + $0x40] sm:$0xff]   ;;  %v2084_v17 = vld [vmem:[#allocation7 + $0x48] sm:$0xff]   ;;  %vm557_vm7 = vcmask 1047559   ;;  %v2086_v51 = vld [vmem:[#allocation7 + $0x58] sm:$0xff]   ;;  %vm770_vm8 = vcmask 64512   ;;  %s1679_s19 = sshll.u32 %s2612_s16, 2 }
  0xa4   : > { %v1683_v18 = vld.sshfl [vmem:[%s2616_s12 + $0x3] sm:$0x1 pattern:$0x75316420]  ;;  %1845 = vmatpush3.bf16.msra.mxu1 %v2083_v16  ;;  %v2081_v53 = vld [vmem:[#allocation7 + $0x30] sm:$0xff]   ;;  %v2082_v2 = vld [vmem:[#allocation7 + $0x38] sm:$0xff]  }
  0xa5   : > { %1827 = vmatpush3.bf16.msra.mxu0 %v2076_v7  ;;  %v431_v13 = vrot.slane %v1680_v11, %v430_v8  ;;  %v445_v15 = vrot.slane %v1681_v12, %v430_v8  ;;  %v459_v19 = vrot.slane %v1682_v14, %v430_v8  ;;  %v1684_v21 = vld.sshfl [vmem:[%s2616_s12 + $0x4] sm:$0x1 pattern:$0x75316420]  ;;  %v473_v22 = vrot.slane %v1683_v18, %v430_v8  ;;  %v2090_v11 = vld [vmem:[#allocation7 + $0x78] sm:$0xff]   ;;  %v2101_v16 = vld [vmem:[#allocation8 + $0x10] sm:$0xff]  }
  0xa6   : > { %1828 = vmatprep.subr.bf16.mxu0 %v2360_v0  ;;  %v2079_v24 = vld [vmem:[#allocation7 + $0x20] sm:$0xff]   ;;  %v487_v26 = vrot.slane %v1684_v21, %v430_v8  ;;  %1846 = vmatprep.subr.bf16.mxu1 %v2360_v0  ;;  %v2080_v44 = vld [vmem:[#allocation7 + $0x28] sm:$0xff]   ;;  %s1751_s14 = sshll.u32 %s2430_s9, 6  ;;  %s381_s27 = scalar_lea.vmem [#allocation11], %s1679_s19 }
  0xa7   : > { %v530_v20 = vunpack.c.l.b16 %v431_v13  ;;  %v531_v23 = vunpack.c.l.b16 %v445_v15  ;;  %v1685_v25 = vld.sshfl [vmem:[%s2616_s12 + $0x5] sm:$0x1 pattern:$0x75316420]  ;;  %v532_v27 = vunpack.c.l.b16 %v459_v19  ;;  %v533_v31 = vunpack.c.l.b16 %v473_v22  ;;  %s1555_s23 = sshll.u32 %s381_s27, 4  ;;  %s2839_s15 = sld [smem:[#allocation18_spill]]  ;;  %s2765_s23 = int_to_ptr.vmem [resolvable:$true] %s1555_s23 }
  0xa8   : > { %v1686_v29 = vld.sshfl [vmem:[%s2616_s12 + $0x6] sm:$0x1 pattern:$0x75316420]  ;;  %v501_v30 = vrot.slane %v1685_v25, %v430_v8  ;;  %v534_v34 = vunpack.c.l.b16 %v487_v26  ;;  %1847 = vmatpush3.bf16.msra.mxu1 %v2084_v17  ;;  %v2102_v17 = vld [vmem:[#allocation8 + $0x18] sm:$0xff]   ;;  %s2273_s11 = scalar_lea.vmem %s2765_s23, 64 }
  0xa9   : > { %1829 = vmatpush3.bf16.msra.mxu0 %v2077_v9  ;;  %v538_v28 = vrot.slane %v530_v20, 1  ;;  %v1687_v32 = vld.sshfl [vmem:[%s2616_s12 + $0x7] sm:$0x1 pattern:$0x75316420]  ;;  %v515_v33 = vrot.slane %v1686_v29, %v430_v8  ;;  %v541_v36 = vrot.slane %v532_v27, 7  ;;  %1848 = vmatprep.subr.bf16.mxu1 %v2360_v0  ;;  %p2274_p8 = scmp.ne.s32.totalorder %s2765_s23, %s2273_s11 }
  0xaa   : > { %1830 = vmatprep.subr.bf16.mxu0 %v2360_v0  ;;  %v529_v37 = vrot.slane %v1687_v32, %v430_v8  ;;  %v535_v38 = vunpack.c.l.b16 %v501_v30  ;;  %v544_v39 = vrot.slane %v533_v31, 6  ;;  %v547_v43 = vrot.slane %v534_v34, 5  ;;  %v2087_v57 = vld [vmem:[#allocation7 + $0x60] sm:$0xff]   ;;  %v2088_v5 = vld [vmem:[#allocation7 + $0x68] sm:$0xff]   ;;  %v2089_v8 = vld [vmem:[#allocation7 + $0x70] sm:$0xff]   ;;  %s1542_s12 = scalar_lea.sflag [#allocation4], %s2612_s16 }
  0xab   : > { %v540_v35 = vsel %vm539_vm1, %v531_v23, %v538_v28  ;;  %v536_v41 = vunpack.c.l.b16 %v515_v33  ;;  %v666_v52 = vrot.slane %v531_v23, 7  ;;  %v668_v55 = vrot.slane %v532_v27, 6  ;;  %v2099_v14 = vld [vmem:[#allocation8] sm:$0xff]   ;;  %v2100_v15 = vld [vmem:[#allocation8 + $0x8] sm:$0xff]   ;;  %v2093_v27 = vld [vmem:[#allocation7 + $0x90] sm:$0xff]   ;;  %p2275_p10 = pnand %p2274_p8, %p2560_p6  ;;  %s2363_s9 = smov [#allocation11]  }
  0xac   : > { %v543_v42 = vsel %vm542_vm2, %v541_v36, %v540_v35  ;;  %v537_v45 = vunpack.c.l.b16 %v529_v37  ;;  %v550_v47 = vrot.slane %v535_v38, 4  ;;  %1849 = vmatpush3.bf16.msra.mxu1 %v2085_v40  ;;  %v670_v56 = vrot.slane %v533_v31, 5  ;;  %v2103_v18 = vld [vmem:[#allocation8 + $0x20] sm:$0xff]   ;;  %v2104_v19 = vld [vmem:[#allocation8 + $0x28] sm:$0xff]   ;;  %v2094_v29 = vld [vmem:[#allocation7 + $0x98] sm:$0xff]   ;;  %s2277_s13 = sshll.u32 %s2363_s9, 4  ;;  %s2278_s13 = int_to_ptr.vmem [resolvable:$false] %s2277_s13 }
  0xad   : > { %1831 = vmatpush3.bf16.msra.mxu0 %v2078_v10  ;;  %v546_v46 = vsel %vm545_vm3, %v544_v39, %v543_v42  ;;  %v553_v49 = vrot.slane %v536_v41, 3  ;;  %1850 = vmatprep.subr.bf16.mxu1 %v2360_v0  ;;  %v667_v58 = vsel %vm539_vm1, %v666_v52, %v530_v20  ;;  %v672_v59 = vrot.slane %v534_v34, 4  ;;  %v2690_v20 = vld [vmem:[#allocation5] sm:$0xff]  ;;  %v2091_v21 = vld [vmem:[#allocation7 + $0x80] sm:$0xff]   ;;  %v2092_v26 = vld [vmem:[#allocation7 + $0x88] sm:$0xff]   ;;  %s2763_s20 = scalar_lea.hbm %s2839_s15, %s1751_s14  ;;  %p2276_p12 = pneg %p2275_p10 }
  0xae   : > { %1832 = vmatprep.subr.bf16.mxu0 %v2360_v0  ;;  %v549_v48 = vsel %vm548_vm4, %v547_v43, %v546_v46  ;;  %v556_v54 = vrot.slane %v537_v45, 2  ;;  %v674_v60 = vrot.slane %v535_v38, 3  ;;  %v669_v62 = vsel %vm542_vm2, %v668_v55, %v667_v58  ;;  %v2095_v33 = vld [vmem:[#allocation7 + $0xa0] sm:$0xff]   ;;  %v2096_v34 = vld [vmem:[#allocation7 + $0xa8] sm:$0xff]   ;;  %v2097_v35 = vld [vmem:[#allocation7 + $0xb0] sm:$0xff]   ;;  %s2279_s21 = scalar_lea.vmem %s2278_s13, 128  ;;  %p2280_p3 = scmp.lt.s32.totalorder %s2765_s23, %s2278_s13 }
  0xaf   : > { %v552_v50 = vsel %vm551_vm5, %v550_v47, %v549_v48  ;;  %v676_v63 = vrot.slane %v536_v41, 2  ;;  %v678_v1 = vrot.slane %v537_v45, 1  ;;  %v671_v3 = vsel %vm545_vm3, %v670_v56, %v669_v62  ;;  %v2098_v36 = vld [vmem:[#allocation7 + $0xb8] sm:$0xff]   ;;  %v2105_v37 = vld [vmem:[#allocation8 + $0x30] sm:$0xff]   ;;  %v2108_v39 = vld [vmem:[#allocation10] sm:$0xff]   ;;  %p2281_p7 = scmp.lt.s32.totalorder %s2279_s21, %s2273_s11 }
  0xb0   : > { %v555_v61 = vsel %vm554_vm6, %v553_v49, %v552_v50  ;;  %1851 = vmatpush3.bf16.msra.mxu1 %v2086_v51  ;;  %v673_v6 = vsel %vm548_vm4, %v672_v59, %v671_v3  ;;  %v2106_v38 = vld [vmem:[#allocation8 + $0x38] sm:$0xff]   ;;  %v2107_v40 = vld [vmem:[#allocation10 + $0x40] sm:$0xff]   ;;  %v2110_v41 = vld [vmem:[#allocation10 + $0x8] sm:$0xff]  }
  0xb1   : > { %1833 = vmatpush3.bf16.msra.mxu0 %v2079_v24  ;;  %1852 = vmatprep.subr.bf16.mxu1 %v2360_v0  ;;  %v558_v4 = vsel %vm557_vm7, %v556_v54, %v555_v61  ;;  %v675_v9 = vsel %vm551_vm5, %v674_v60, %v673_v6  ;;  %v2109_v42 = vld [vmem:[#allocation10 + $0x48] sm:$0xff]   ;;  %v2112_v43 = vld [vmem:[#allocation10 + $0x10] sm:$0xff]   ;;  %v2114_v45 = vld [vmem:[#allocation10 + $0x18] sm:$0xff]   ;;  %p2282_p9 = por %p2281_p7, %p2280_p3 }
  0xb2   : > { %1834 = vmatprep.subr.bf16.mxu0 %v2360_v0  ;;  %v2666_v7 = vpack.c.b16 %v558_v4, %v558_v4  ;;  %v677_v10 = vsel %vm554_vm6, %v676_v63, %v675_v9  ;;  %v2113_v46 = vld [vmem:[#allocation10 + $0x58] sm:$0xff]   ;;  %v2116_v47 = vld [vmem:[#allocation10 + $0x20] sm:$0xff]   ;;  %v2118_v49 = vld [vmem:[#allocation10 + $0x28] sm:$0xff]  }
  0xb3   : > { %v679_v12 = vsel %vm557_vm7, %v678_v1, %v677_v10  ;;  %v2115_v48 = vld [vmem:[#allocation10 + $0x60] sm:$0xff]   ;;  %v2117_v50 = vld [vmem:[#allocation10 + $0x68] sm:$0xff]   ;;  %v2119_v51 = vld [vmem:[#allocation10 + $0x70] sm:$0xff]   ;;  %p2283_p13 = pnand %p2282_p9, %p2276_p12 }
  0xb4   : > { %1853 = vmatpush3.bf16.msra.mxu1 %v2087_v57  ;;  %v2678_v13 = vpack.c.b16 %v679_v12, %v679_v12  ;;  %v2120_v52 = vld [vmem:[#allocation10 + $0x30] sm:$0xff]   ;;  %v2122_v54 = vld [vmem:[#allocation10 + $0x38] sm:$0xff]   ;;  %v1713_v59 = vld [vmem:[%s2810_s3] ss:$0 sm:$0xff] }
  0xb5   : > { %1835 = vmatpush3.bf16.msra.mxu0 %v2080_v44  ;;  %1854 = vmatprep.subr.bf16.mxu1 %v2360_v0  ;;  %v2111_v44 = vld [vmem:[#allocation10 + $0x50] sm:$0xff]   ;;  %v2123_v3 = vld [vmem:[#allocation10 + $0x80] sm:$0xff]   ;;  %v2128_v9 = vld [vmem:[#allocation10 + $0xa8] sm:$0xff]  }
  0xb6   : > { %1836 = vmatprep.subr.bf16.mxu0 %v2360_v0  ;;  %v2125_v6 = vld [vmem:[#allocation10 + $0x90] sm:$0xff]  }
  0xb7   : > { %v2129_v10 = vld [vmem:[#allocation10 + $0xb0] sm:$0xff]  }
  0xb8   : > { %1855 = vmatpush3.bf16.msra.mxu1 %v2088_v5  ;;  %v2124_v5 = vld [vmem:[#allocation10 + $0x88] sm:$0xff]  }
  0xb9   : > { %1837 = vmatpush3.bf16.msra.mxu0 %v2081_v53  ;;  %1856 = vmatprep.subr.bf16.mxu1 %v2360_v0  ;;  %v2121_v53 = vld [vmem:[#allocation10 + $0x78] sm:$0xff]  }
  0xba   : > { %1838 = vmatprep.subr.bf16.mxu0 %v2360_v0 }
  0xbc   : > { %1857 = vmatpush3.bf16.msra.mxu1 %v2089_v8  ;;  %v2127_v8 = vld [vmem:[#allocation10 + $0xa0] sm:$0xff]  }
  0xbd   : > { %1839 = vmatpush3.bf16.msra.mxu0 %v2082_v2  ;;  %1858 = vmatprep.subr.bf16.mxu1 %v2360_v0 }
  0xbe   : > { %1889 = vmatprep.subr.bf16.mxu0 %v2360_v0 }
  0xc0   : > { %1841 = vmatmul.mubr.bf16.vlgmr.msra.gmra.mrb[0].mxu0 %v2666_v7  ;;  %1859 = vmatpush3.bf16.msra.mxu1 %v2090_v11  ;;  %v2130_v11 = vld [vmem:[#allocation10 + $0xb8] sm:$0xff]  }
  0xc1   : > { %1905 = vmatprep.mubr.msk.bf16.mxu0 %vm2361_vm0, %v2360_v0  ;;  %1864 = vmatprep.subr.mxu1 %v2360_v0 }
  0xc2   : > { %1890 = vmatpush3.bf16.msra.mxu0 %v2099_v14 }
  0xc3   : > { %1861 = vmatmul.mubr.bf16.vlgmr.msra.gmra.mrb[0].mxu1 %v2678_v13  ;;  %1891 = vmatprep.subr.bf16.mxu0 %v2360_v0 }
  0xc4   : > { %1866 = vmatprep.mubr.msk.f32.mxu1 %vm2361_vm0, %v2360_v0 }
  0xc6   : > { %1892 = vmatpush3.bf16.msra.mxu0 %v2100_v15 }
  0xc7   : > { %1893 = vmatprep.subr.bf16.mxu0 %v2360_v0 }
  0xca   : > { %1894 = vmatpush3.bf16.msra.mxu0 %v2101_v16 }
  0xcb   : > { %1895 = vmatprep.subr.bf16.mxu0 %v2360_v0 }
  0xce   : > { %1896 = vmatpush3.bf16.msra.mxu0 %v2102_v17 }
  0xcf   : > { %1897 = vmatprep.subr.bf16.mxu0 %v2360_v0 }
  0xd2   : > { %1898 = vmatpush3.bf16.msra.mxu0 %v2103_v18 }
  0xd3   : > { %1899 = vmatprep.subr.bf16.mxu0 %v2360_v0 }
  0xd6   : > { %1900 = vmatpush3.bf16.msra.mxu0 %v2104_v19 }
  0xd7   : > { %1901 = vmatprep.subr.bf16.mxu0 %v2360_v0 }
  0xda   : > { %1902 = vmatpush3.bf16.msra.mxu0 %v2105_v37 }
  0xdb   : > { %1903 = vmatprep.subr.bf16.mxu0 %v2360_v0 }
  0xde   : > { %1904 = vmatpush3.bf16.msra.mxu0 %v2106_v38 }
  0xdf   : > { %1929 = vmatprep.subr.bf16.mxu0 %v2360_v0 }
  0xe1   : > { %1906 = vmatmul.mubr.bf16.vlgmr.msra.gmra.mrb[4].mxu0 %v2678_v13 }
  0xe2   : > { %1930 = vmatpush3.bf16.msra.mxu0 %v2107_v40  ;;  %1945 = vmatprep.mubr.msk.bf16.mxu0 %vm2361_vm0, %v2360_v0 }
  0xe3   : > { %1931 = vmatprep.subr.bf16.mxu0 %v2360_v0 }
  0xe6   : > { %1932 = vmatpush3.bf16.msra.mxu0 %v2109_v42 }
  0xe7   : > { %1933 = vmatprep.subr.bf16.mxu0 %v2360_v0 }
  0xea   : > { %1934 = vmatpush3.bf16.msra.mxu0 %v2111_v44 }
  0xeb   : > { %1935 = vmatprep.subr.bf16.mxu0 %v2360_v0 }
  0xee   : > { %1936 = vmatpush3.bf16.msra.mxu0 %v2113_v46 }
  0xef   : > { %1937 = vmatprep.subr.bf16.mxu0 %v2360_v0 }
  0xf2   : > { %1938 = vmatpush3.bf16.msra.mxu0 %v2115_v48 }
  0xf3   : > { %1939 = vmatprep.subr.bf16.mxu0 %v2360_v0 }
  0xf6   : > { %1940 = vmatpush3.bf16.msra.mxu0 %v2117_v50 }
  0xf7   : > { %1941 = vmatprep.subr.bf16.mxu0 %v2360_v0 }
  0xfa   : > { %1942 = vmatpush3.bf16.msra.mxu0 %v2119_v51 }
  0xfb   : > { %1943 = vmatprep.subr.bf16.mxu0 %v2360_v0 }
  0xfe   : > { %1944 = vmatpush3.bf16.msra.mxu0 %v2121_v53 }
  0xff   : > { %1954 = vmatprep.subr.bf16.mxu0 %v2360_v0 }
 0x193   : > { %v643_v22 = vpop.f32.mrb[0].mxu0 }
 0x194   : > { %v1842_v23 = vpop.f32.mrb[1].mxu0  ;;  %1865 = vmatpush3.msra.mxu1 %v643_v22 }
 0x195   : > { %v646_v24 = vpop.f32.mrb[2].mxu0  ;;  %1867 = vmatmul.mubr.msk.f32.vlgmr.msra.gmra.mrb[4].mxu1 %vm770_vm8, %v2690_v20  ;;  %1869 = vmatprep.subr.bf16.mxu1 %v2360_v0 }
 0x196   : > { %v1843_v25 = vpop.f32.mrb[3].mxu0  ;;  %1870 = vmatpush3.bf16.msra.mxu1 %v2091_v21  ;;  %1885 = vmatprep.mubr.msk.bf16.mxu1 %vm2361_vm0, %v2360_v0  ;;  %v2699_v28 = vpop.f32.mrb[0].mxu1 }
 0x197   : > { %1871 = vmatprep.subr.bf16.mxu1 %v2360_v0  ;;  %v1862_v30 = vpop.f32.mrb[1].mxu1  ;;  %v385_v25 = vld [vmem:[#allocation5 + $0x8] sm:$0xff] }
 0x198   : > { %v767_v31 = vpop.f32.mrb[2].mxu1 }
 0x199   : > { %v1863_v32 = vpop.f32.mrb[3].mxu1 }
 0x19a   : > { %1872 = vmatpush3.bf16.msra.mxu1 %v2092_v26  ;;  %v1714_v32 = vld [vmem:[%s2812_s5] ss:$0 sm:$0xff] }
 0x19b   : > { %1873 = vmatprep.subr.bf16.mxu1 %v2360_v0 }
 0x19e   : > { %1874 = vmatpush3.bf16.msra.mxu1 %v2093_v27 }
 0x19f   : > { %1875 = vmatprep.subr.bf16.mxu1 %v2360_v0 }
 0x1a2   : > { %1876 = vmatpush3.bf16.msra.mxu1 %v2094_v29 }
 0x1a3   : > { %1877 = vmatprep.subr.bf16.mxu1 %v2360_v0 }
 0x1a6   : > { %1878 = vmatpush3.bf16.msra.mxu1 %v2095_v33 }
 0x1a7   : > { %1879 = vmatprep.subr.bf16.mxu1 %v2360_v0 }
 0x1aa   : > { %1880 = vmatpush3.bf16.msra.mxu1 %v2096_v34 }
 0x1ab   : > { %1881 = vmatprep.subr.bf16.mxu1 %v2360_v0 }
 0x1ae   : > { %1882 = vmatpush3.bf16.msra.mxu1 %v2097_v35 }
 0x1af   : > { %1883 = vmatprep.subr.bf16.mxu1 %v2360_v0 }
 0x1b2   : > { %1884 = vmatpush3.bf16.msra.mxu1 %v2098_v36 }
 0x1b3   : > { %1909 = vmatprep.subr.bf16.mxu1 %v2360_v0 }
 0x1b4   : > { %v1064_v12 = vpop.f32.mrb[4].mxu0 }
 0x1b5   : > { %1886 = vmatmul.mubr.bf16.vlgmr.msra.gmra.mrb[8].mxu1 %v2666_v7  ;;  %v2126_v7 = vld [vmem:[#allocation10 + $0x98] sm:$0xff]   ;;  %v1907_v13 = vpop.f32.mrb[5].mxu0  ;;  %v1065_v36 = vadd.f32 %v1714_v32, %v1064_v12 }
 0x1b6   : > { %1925 = vmatprep.mubr.msk.bf16.mxu1 %vm2361_vm0, %v2360_v0  ;;  %1910 = vmatpush3.bf16.msra.mxu1 %v2108_v39  ;;  %v1067_v14 = vpop.f32.mrb[6].mxu0 }
 0x1b7   : > { %1911 = vmatprep.subr.bf16.mxu1 %v2360_v0  ;;  %v1908_v15 = vpop.f32.mrb[7].mxu0 }
 0x1ba   : > { %1912 = vmatpush3.bf16.msra.mxu1 %v2110_v41 }
 0x1bb   : > { %1913 = vmatprep.subr.bf16.mxu1 %v2360_v0 }
 0x1be   : > { %1914 = vmatpush3.bf16.msra.mxu1 %v2112_v43 }
 0x1bf   : > { %1915 = vmatprep.subr.bf16.mxu1 %v2360_v0 }
 0x1c2   : > { %1916 = vmatpush3.bf16.msra.mxu1 %v2114_v45 }
 0x1c3   : > { %1917 = vmatprep.subr.bf16.mxu1 %v2360_v0 }
 0x1c6   : > { %1918 = vmatpush3.bf16.msra.mxu1 %v2116_v47 }
 0x1c7   : > { %1919 = vmatprep.subr.bf16.mxu1 %v2360_v0 }
 0x1ca   : > { %1920 = vmatpush3.bf16.msra.mxu1 %v2118_v49 }
 0x1cb   : > { %1921 = vmatprep.subr.bf16.mxu1 %v2360_v0 }
 0x1ce   : > { %1922 = vmatpush3.bf16.msra.mxu1 %v2120_v52 }
 0x1cf   : > { %1923 = vmatprep.subr.bf16.mxu1 %v2360_v0 }
 0x1d2   : > { %1924 = vmatpush3.bf16.msra.mxu1 %v2122_v54 }
 0x1d3   : > { %1949 = vmatprep.subr.mxu1 %v2360_v0 }
 0x268   : > { %v840_v55 = vpop.f32.mrb[4].mxu1 }
 0x269   : > { %v841_v56 = vadd.f32 %v840_v55, %v2699_v28  ;;  %v1868_v57 = vpop.f32.mrb[5].mxu1 }
 0x288   : > { %v943_v58 = vpop.f32.mrb[8].mxu1 }
 0x289   : > { %v949_v60 = vadd.f32 %v943_v58, %v841_v56  ;;  %v1887_v61 = vpop.f32.mrb[9].mxu1 }
 0x28a   : > { %v946_v62 = vpop.f32.mrb[10].mxu1 }
 0x28b   : > { %v957_v63 = vadd.f32 %v1713_v59, %v949_v60  ;;  %v1888_v1 = vpop.f32.mrb[11].mxu1 }
 0x28d   : > { %v958_v2 = vmax.f32 %v957_v63, 0.0 }
 0x28f   : > { %v1070_v4 = vpack.c.bf16 %v958_v2, %v958_v2 }
 0x291   : > { %1926 = vmatmul.mubr.bf16.vlgmr.msra.gmra.mrb[12].mxu1 %v1070_v4  ;;  %1946 = vmatmul.mubr.bf16.vlgmr.msra.gmra.mrb[8].mxu0 %v1070_v4 }
 0x292   : > { %1955 = vmatpush3.bf16.msra.mxu0 %v2123_v3  ;;  %1970 = vmatprep.mubr.msk.bf16.mxu0 %vm2361_vm0, %v2360_v0 }
 0x293   : > { %1956 = vmatprep.subr.bf16.mxu0 %v2360_v0  ;;  %1951 = vmatprep.mubr.msk.f32.mxu1 %vm2361_vm0, %v2360_v0 }
 0x296   : > { %1957 = vmatpush3.bf16.msra.mxu0 %v2124_v5 }
 0x297   : > { %1958 = vmatprep.subr.bf16.mxu0 %v2360_v0 }
 0x29a   : > { %1959 = vmatpush3.bf16.msra.mxu0 %v2125_v6 }
 0x29b   : > { %1960 = vmatprep.subr.bf16.mxu0 %v2360_v0 }
 0x29e   : > { %1961 = vmatpush3.bf16.msra.mxu0 %v2126_v7 }
 0x29f   : > { %1962 = vmatprep.subr.bf16.mxu0 %v2360_v0 }
 0x2a2   : > { %1963 = vmatpush3.bf16.msra.mxu0 %v2127_v8 }
 0x2a3   : > { %1964 = vmatprep.subr.bf16.mxu0 %v2360_v0 }
 0x2a6   : > { %1965 = vmatpush3.bf16.msra.mxu0 %v2128_v9 }
 0x2a7   : > { %1966 = vmatprep.subr.bf16.mxu0 %v2360_v0 }
 0x2aa   : > { %1967 = vmatpush3.bf16.msra.mxu0 %v2129_v10 }
 0x2ab   : > { %1968 = vmatprep.subr.bf16.mxu0 %v2360_v0 }
 0x2ae   : > { %1969 = vmatpush3.bf16.msra.mxu0 %v2130_v11 }
 0x2b1   : > { %1971 = vmatmul.mubr.bf16.vlgmr.msra.gmra.mrb[12].mxu0 %v1070_v4 }
 0x364   : > { %v1169_v16 = vpop.f32.mrb[12].mxu1  ;;  %v1274_v17 = vpop.f32.mrb[8].mxu0 }
 0x365   : > { %v1927_v18 = vpop.f32.mrb[13].mxu1  ;;  %v1947_v19 = vpop.f32.mrb[9].mxu0  ;;  %1950 = vmatpush3.msra.mxu1 %v1169_v16 }
 0x366   : > { %v1172_v21 = vpop.f32.mrb[14].mxu1  ;;  %v1277_v22 = vpop.f32.mrb[10].mxu0  ;;  %1952 = vmatmul.mubr.msk.f32.vlgmr.msra.gmra.mrb[6].mxu1 %vm770_vm8, %v2690_v20  ;;  %1974 = vmatprep.subr.mxu1 %v2360_v0 }
 0x367   : > { %v1928_v23 = vpop.f32.mrb[15].mxu1  ;;  %v1948_v24 = vpop.f32.mrb[11].mxu0  ;;  %1976 = vmatprep.mubr.msk.f32.mxu1 %vm2361_vm0, %v2360_v0  ;;  %v1749_v0 = vld [vmem:[%s2814_s7] ss:$0 sm:$0xff] }
 0x384   : > { %v1449_v26 = vpop.f32.mrb[12].mxu0 }
 0x385   : > { %v1972_v27 = vpop.f32.mrb[13].mxu0  ;;  %1975 = vmatpush3.msra.mxu1 %v1449_v26 }
 0x386   : > { %v1452_v28 = vpop.f32.mrb[14].mxu0  ;;  %1977 = vmatmul.mubr.msk.f32.vlgmr.msra.gmra.mrb[16].mxu1 %vm770_vm8, %v385_v25 }
 0x387   : > { %v1973_v29 = vpop.f32.mrb[15].mxu0 }
 0x439   : > { %v1346_v30 = vpop.f32.mrb[6].mxu1 }
 0x43a   : > { %v1347_v31 = vadd.f32 %v1346_v30, %v1274_v17  ;;  %v1953_v20 = vpop.f32.mrb[7].mxu1 }
 0x459   : > { %v1524_v33 = vpop.f32.mrb[16].mxu1 }
 0x45a   : > { %v1528_v34 = vadd.f32 %v1524_v33, %v1347_v31  ;;  %v1978_v35 = vpop.f32.mrb[17].mxu1 }
 0x45c   : > { %v1536_v37 = vadd.f32 %v1749_v0, %v1528_v34 }
 0x45e   : > { %v1537_v38 = vadd.f32 %v1536_v37, %v1065_v36 }
 0x460   : > { %v1538_v39 = vmax.f32 %v1537_v38, 0.0 }
 0x462   : > { %v1539_v40 = vpack.c.bf16 %v1538_v39, %v1538_v39 }
 0x464   : > { %1540 = vst [vmem:[%s381_s27] sm:$0xf] %v1539_v40 }
 0x465   : > { %2286 = shalt.err (!%p2283_p13)
}
 0x466   : > { %s2287_s16 = scalar_lea.hbm %s2763_s20, 64  ;;  %s2291_s22 = scalar_lea.hbm %s2839_s15, 128 }
 0x467   : > { %p2288_p0 = scmp.ne.s32.totalorder %s2763_s20, %s2287_s16  ;;  %p2292_p1 = scmp.lt.u32.totalorder %s2763_s20, %s2839_s15 }
 0x468   : > { %p2293_p2 = scmp.lt.u32.totalorder %s2291_s22, %s2287_s16  ;;  %p2295_p8 = scmp.lt.u32.totalorder %s2287_s16, %s2763_s20 }
 0x469   : > { %p2289_p5 = pnand %p2288_p0, %p2560_p6 }
 0x46a   : > { %p2294_p4 = por %p2293_p2, %p2292_p1 }
 0x46b   : > { %p2290_p11 = pneg %p2289_p5 }
 0x46c   : > { %p2296_p10 = por %p2295_p8, %p2294_p4 }
 0x46e   : > { %p2297_p12 = pnand %p2296_p10, %p2290_p11 }
 0x470   : > { %2300 = shalt.err (!%p2297_p12)
}
 0x471   : > { %1997 = dma.vmem_to_hbm [thread:$0]  (%p2560_p6), %s2765_s23, 64, %s2763_s20, %s1542_s12  }
 0x472 PF: > { %s2840_s27 = sld [smem:[#allocation16_spill]]  ;;  %s2841_s10 = sld [smem:[#allocation17_spill]] }
 0x473   : > { %p2843_p7 = scmp.ge.s32.totalorder %s2347_s30, 2 }
 0x478   : > { %s1567_s18 = sand.u32 1, %s2840_s27   ;;  %p2842_p3 = scmp.ne.s32.totalorder %s2841_s10, 0 }
 0x479   : > { %s1568_s11 = scalar_lea.sflag [#allocation4], %s1567_s18 }
 0x47a   : > { %p2017_p9 = pnand %p2843_p7, %p2842_p3 }
 0x47c   : > { %2330 = dma.done.wait (!%p2017_p9), %s1568_s11, 64  }
 0x47d   : > { %2332 = vsyncadd (!%p2017_p9), %s1568_s11, 4294967232  ;;  %p23_p13 = scmp.ge.s32.totalorder %s2550_s24, 4   ;;  %s2844_s27 = smov %s2339_s28 }
 0x47e   : > { %s2845_s28 = smov %s2343_s29  ;;  %s2846_s29 = smov %s2566_s17 }
 0x47f   : > { %s2847_s30 = smov %s2550_s24  ;;  %25 = sbr.rel (!%p23_p13) target bundleno = 9 (0x9), region = 118 }
 0x486   :  { %1573 = vsyncpa [#allocation3], 1 }
 0x487   :  { %1575 = vsyncpa [#allocation3 + $0x1], 1 }
 0x488   :  { %1576 = vsyncpa [#allocation6], 1 }
 0x489   :  { %1577 = vsyncpa [#allocation9], 1 }
 0x48a   :  { %1578 = vsyncpa [#allocation4], 1 }
 0x48b   :  { %1580 = vsyncpa [#allocation4 + $0x1], 1 }

</bundles_post_ra>
